<compile_context>
chip_gen: v6e
topology: v6e:2x2x1
jax: 0.10.0
libtpu: 0.0.40
codegen_flags: <defaults>
</compile_context>

<pallas_src>
import jax
import jax.numpy as jnp
from jax.experimental import pallas as pl
from jax.experimental.pallas import tpu as pltpu

CONDS = 6
TARGETS = 4
IN_DIM = TARGETS + CONDS          # 10
HID = 128


def disc_kernel(x_ref, w1_ref, b1_ref, w2_ref, b2_ref, w34_ref, b34_ref, o_ref):
    cd = w1_ref.dtype                         # MXU compute dtype (bf16 or f32)

    # Layer 1: Linear(10->128) + LeakyReLU(0.2).  K=10, unpadded.
    x = x_ref[...].astype(cd)
    h = jnp.dot(x, w1_ref[...], preferred_element_type=jnp.float32) + b1_ref[...]
    h = jnp.maximum(h, 0.2 * h)
    # Dropout(0.3): identity in eval mode.

    # Layer 2: Linear(128->128) + LeakyReLU(0.2).
    h = jnp.dot(h.astype(cd), w2_ref[...],
                preferred_element_type=jnp.float32) + b2_ref[...]
    h = jnp.maximum(h, 0.2 * h)
    # Dropout(0.3): identity in eval mode.

    # Layers 3+4 folded offline: Linear(128->128) @ Linear(128->1) == (128->1).
    # Done as VPU multiply + XLU lane-reduce in f32 (no skinny MXU matmul).
    logit = jnp.sum(h * w34_ref[...], axis=-1, keepdims=True) + b34_ref[...]

    # Sigmoid (f32 VPU/EUP).
    o_ref[...] = 1.0 / (1.0 + jnp.exp(-logit))


def make_params(key):
    """PyTorch nn.Linear default init: U(-1/sqrt(fan_in), 1/sqrt(fan_in))."""
    ks = jax.random.split(key, 8)

    def linear(kw, kb, fan_in, fan_out):
        bound = 1.0 / jnp.sqrt(jnp.float32(fan_in))
        w = jax.random.uniform(kw, (fan_in, fan_out), jnp.float32, -bound, bound)
        b = jax.random.uniform(kb, (fan_out,), jnp.float32, -bound, bound)
        return w, b

    w1, b1 = linear(ks[0], ks[1], IN_DIM, HID)
    w2, b2 = linear(ks[2], ks[3], HID, HID)
    w3, b3 = linear(ks[4], ks[5], HID, HID)
    w4, b4 = linear(ks[6], ks[7], HID, 1)
    return (w1, b1, w2, b2, w3, b3, w4, b4)


def prepare_kernel_params(params, compute_dtype=jnp.bfloat16):
    """One-time fold / reshape / cast of the weights for the kernel."""
    w1, b1, w2, b2, w3, b3, w4, b4 = params
    w34 = (w3 @ w4).reshape(1, HID)           # (1, 128) row, kept f32
    b34 = (b3 @ w4 + b4).reshape(1, 1)        # scalar bias, kept f32
    return (
        w1.astype(compute_dtype),             # (10, 128)
        b1.reshape(1, HID).astype(jnp.float32),
        w2.astype(compute_dtype),             # (128, 128)
        b2.reshape(1, HID).astype(jnp.float32),
        w34.astype(jnp.float32),
        b34.astype(jnp.float32),
    )


def _round_up(n, m):
    return ((n + m - 1) // m) * m


def discriminator_forward(x, kernel_params, *, tb=2048):
    """x: (B, 10) f32.  kernel_params: output of prepare_kernel_params."""
    w1, b1, w2, b2, w34, b34 = kernel_params
    B = x.shape[0]
    x = x.astype(jnp.float32)

    # Batch tile: multiple of 8 sublanes; pad the ragged tail with zero rows.
    tb = _round_up(tb, 8)
    tb_eff = min(tb, _round_up(B, 8))
    bp = _round_up(B, tb_eff)
    if bp != B:
        x = jnp.pad(x, ((0, bp - B), (0, 0)))

    grid = (pl.cdiv(bp, tb_eff),)

    def batch_spec(last):
        return pl.BlockSpec((tb_eff, last), lambda i: (i, 0))

    def const_spec(shape):
        return pl.BlockSpec(shape, lambda i: (0, 0))

    out = pl.pallas_call(
        disc_kernel,
        out_shape=jax.ShapeDtypeStruct((bp, 1), jnp.float32),
        grid=grid,
        in_specs=[
            batch_spec(IN_DIM),                 # x      (TB, 10)
            const_spec((IN_DIM, HID)),          # w1     resident
            const_spec((1, HID)),               # b1     resident
            const_spec((HID, HID)),             # w2     resident
            const_spec((1, HID)),               # b2     resident
            const_spec((1, HID)),               # w34    resident
            const_spec((1, 1)),                 # b34    resident
        ],
        out_specs=batch_spec(1),                # out    (TB, 1)
        compiler_params=pltpu.CompilerParams(
            dimension_semantics=("parallel",)),
    )(x, w1, b1, w2, b2, w34, b34)

    return out[:B]


def reference_forward(x, params):
    """Pure-JAX reference matching the PyTorch module (eval mode)."""
    w1, b1, w2, b2, w3, b3, w4, b4 = params
    h = x @ w1 + b1
    h = jnp.where(h > 0, h, 0.2 * h)
    h = h @ w2 + b2
    h = jnp.where(h > 0, h, 0.2 * h)
    h = h @ w3 + b3
    h = h @ w4 + b4
    return jax.nn.sigmoid(h)


if __name__ == "__main__":
    key = jax.random.PRNGKey(0)
    kx, kp = jax.random.split(key)

    B = 19   # deliberately not a tile multiple: exercises tail padding
    x = jax.random.normal(kx, (B, IN_DIM), jnp.float32)
    params = make_params(kp)
    ref = reference_forward(x, params)

    # f32 MXU operands; small tile so the batch grid takes several steps.
    out_f32 = discriminator_forward(
        x, prepare_kernel_params(params, jnp.float32), tb=8)
    out_f32 = jax.block_until_ready(out_f32)
    assert out_f32.shape == (B, 1), out_f32.shape
    err_f32 = jnp.max(jnp.abs(out_f32 - ref))
    assert err_f32 < 5e-3, f"f32 path max abs err {err_f32}"

    # bf16 MXU operands (default fast path); looser tolerance for bf16 rounding.
    out_bf16 = discriminator_forward(x, prepare_kernel_params(params))
    out_bf16 = jax.block_until_ready(out_bf16)
    assert out_bf16.shape == (B, 1), out_bf16.shape
    err_bf16 = jnp.max(jnp.abs(out_bf16 - ref))
    assert err_bf16 < 2e-2, f"bf16 path max abs err {err_bf16}"

    print("KERNEL_OK")
</pallas_src>

<mosaic_0001>
module attributes {stable_mosaic.version = 11 : i64} {
  func.func @disc_kernel(%arg0: i32, %arg1: memref<8x10xf32, #tpu.memory_space<vmem>>, %arg2: memref<10x128xf32, #tpu.memory_space<vmem>>, %arg3: memref<1x128xf32, #tpu.memory_space<vmem>>, %arg4: memref<128x128xf32, #tpu.memory_space<vmem>>, %arg5: memref<1x128xf32, #tpu.memory_space<vmem>>, %arg6: memref<1x128xf32, #tpu.memory_space<vmem>>, %arg7: memref<1x1xf32, #tpu.memory_space<vmem>>, %arg8: memref<8x1xf32, #tpu.memory_space<vmem>>) attributes {dimension_semantics = [#tpu.dimension_semantics<parallel>], iteration_bounds = array<i64: 3>, scalar_prefetch = 0 : i64, scratch_operands = 0 : i64, tpu.core_type = #tpu.core_type<tc>, window_params = [{transform_indices = @transform_0, window_bounds = array<i64: 8, 10>}, {pipeline_mode = #tpu.pipeline_mode<synchronous>, transform_indices = @transform_1, window_bounds = array<i64: 10, 128>}, {pipeline_mode = #tpu.pipeline_mode<synchronous>, transform_indices = @transform_2, window_bounds = array<i64: 1, 128>}, {pipeline_mode = #tpu.pipeline_mode<synchronous>, transform_indices = @transform_3, window_bounds = array<i64: 128, 128>}, {pipeline_mode = #tpu.pipeline_mode<synchronous>, transform_indices = @transform_4, window_bounds = array<i64: 1, 128>}, {pipeline_mode = #tpu.pipeline_mode<synchronous>, transform_indices = @transform_5, window_bounds = array<i64: 1, 128>}, {pipeline_mode = #tpu.pipeline_mode<synchronous>, transform_indices = @transform_6, window_bounds = array<i64: 1, 1>}, {transform_indices = @transform_7, window_bounds = array<i64: 8, 1>}]} {
    %c0 = arith.constant 0 : index
    %c0_0 = arith.constant 0 : index
    %0 = vector.load %arg1[%c0, %c0_0] : memref<8x10xf32, #tpu.memory_space<vmem>>, vector<8x10xf32>
    %c0_1 = arith.constant 0 : index
    %c0_2 = arith.constant 0 : index
    %1 = vector.load %arg2[%c0_1, %c0_2] : memref<10x128xf32, #tpu.memory_space<vmem>>, vector<10x128xf32>
    %cst = arith.constant dense<0.000000e+00> : vector<8x128xf32>
    %2 = tpu.matmul %0, %1, %cst {dimension_numbers = #tpu.dot_dimension_numbers<[1], [0], [0], [1], [0, 0, 1, 1], [], []>} : vector<8x10xf32>, vector<10x128xf32>, vector<8x128xf32> -> vector<8x128xf32>
    %c0_3 = arith.constant 0 : index
    %c0_4 = arith.constant 0 : index
    %3 = vector.load %arg3[%c0_3, %c0_4] : memref<1x128xf32, #tpu.memory_space<vmem>>, vector<1x128xf32>
    %4 = vector.broadcast %3 : vector<1x128xf32> to vector<8x128xf32>
    %5 = arith.addf %2, %4 : vector<8x128xf32>
    %cst_5 = arith.constant 2.000000e-01 : f32
    %6 = vector.broadcast %cst_5 : f32 to vector<8x128xf32>
    %7 = arith.mulf %6, %5 : vector<8x128xf32>
    %8 = arith.maximumf %5, %7 : vector<8x128xf32>
    %c0_6 = arith.constant 0 : index
    %c0_7 = arith.constant 0 : index
    %9 = vector.load %arg4[%c0_6, %c0_7] : memref<128x128xf32, #tpu.memory_space<vmem>>, vector<128x128xf32>
    %cst_8 = arith.constant dense<0.000000e+00> : vector<8x128xf32>
    %10 = tpu.matmul %8, %9, %cst_8 {dimension_numbers = #tpu.dot_dimension_numbers<[1], [0], [0], [1], [0, 0, 1, 1], [], []>} : vector<8x128xf32>, vector<128x128xf32>, vector<8x128xf32> -> vector<8x128xf32>
    %c0_9 = arith.constant 0 : index
    %c0_10 = arith.constant 0 : index
    %11 = vector.load %arg5[%c0_9, %c0_10] : memref<1x128xf32, #tpu.memory_space<vmem>>, vector<1x128xf32>
    %12 = vector.broadcast %11 : vector<1x128xf32> to vector<8x128xf32>
    %13 = arith.addf %10, %12 : vector<8x128xf32>
    %cst_11 = arith.constant 2.000000e-01 : f32
    %14 = vector.broadcast %cst_11 : f32 to vector<8x128xf32>
    %15 = arith.mulf %14, %13 : vector<8x128xf32>
    %16 = arith.maximumf %13, %15 : vector<8x128xf32>
    %c0_12 = arith.constant 0 : index
    %c0_13 = arith.constant 0 : index
    %17 = vector.load %arg6[%c0_12, %c0_13] : memref<1x128xf32, #tpu.memory_space<vmem>>, vector<1x128xf32>
    %18 = vector.broadcast %17 : vector<1x128xf32> to vector<8x128xf32>
    %19 = arith.mulf %16, %18 : vector<8x128xf32>
    %cst_14 = arith.constant dense<0.000000e+00> : vector<8xf32>
    %20 = vector.multi_reduction <add>, %19, %cst_14 [1] : vector<8x128xf32> to vector<8xf32>
    %21 = vector.shape_cast %20 : vector<8xf32> to vector<8x1xf32>
    %c0_15 = arith.constant 0 : index
    %c0_16 = arith.constant 0 : index
    %22 = vector.load %arg7[%c0_15, %c0_16] : memref<1x1xf32, #tpu.memory_space<vmem>>, vector<1x1xf32>
    %23 = vector.broadcast %22 : vector<1x1xf32> to vector<8x1xf32>
    %24 = arith.addf %21, %23 : vector<8x1xf32>
    %cst_17 = arith.constant 0.000000e+00 : f32
    %25 = vector.broadcast %cst_17 : f32 to vector<8x1xf32>
    %26 = arith.subf %25, %24 : vector<8x1xf32>
    %27 = math.exp %26 : vector<8x1xf32>
    %cst_18 = arith.constant 1.000000e+00 : f32
    %28 = vector.broadcast %cst_18 : f32 to vector<8x1xf32>
    %29 = arith.addf %28, %27 : vector<8x1xf32>
    %cst_19 = arith.constant 1.000000e+00 : f32
    %30 = vector.broadcast %cst_19 : f32 to vector<8x1xf32>
    %31 = arith.divf %30, %29 : vector<8x1xf32>
    %c0_20 = arith.constant 0 : index
    %c0_21 = arith.constant 0 : index
    %32 = vector.load %arg8[%c0_20, %c0_21] : memref<8x1xf32, #tpu.memory_space<vmem>>, vector<8x1xf32>
    tpu.vector_store %arg8[%c0_20, %c0_21], %31 {strides = array<i32>} : memref<8x1xf32, #tpu.memory_space<vmem>>, vector<8x1xf32>,
    return
  }
  func.func @transform_0(%arg0: i32) -> (i32, i32) {
    %c0_i32 = arith.constant 0 : i32
    %c0_i32_0 = arith.constant 0 : i32
    return %arg0, %c0_i32 : i32, i32
  }
  func.func @transform_1(%arg0: i32) -> (i32, i32) {
    %c0_i32 = arith.constant 0 : i32
    %c0_i32_0 = arith.constant 0 : i32
    %c0_i32_1 = arith.constant 0 : i32
    return %c0_i32, %c0_i32_0 : i32, i32
  }
  func.func @transform_2(%arg0: i32) -> (i32, i32) {
    %c0_i32 = arith.constant 0 : i32
    %c0_i32_0 = arith.constant 0 : i32
    %c0_i32_1 = arith.constant 0 : i32
    return %c0_i32, %c0_i32_0 : i32, i32
  }
  func.func @transform_3(%arg0: i32) -> (i32, i32) {
    %c0_i32 = arith.constant 0 : i32
    %c0_i32_0 = arith.constant 0 : i32
    %c0_i32_1 = arith.constant 0 : i32
    return %c0_i32, %c0_i32_0 : i32, i32
  }
  func.func @transform_4(%arg0: i32) -> (i32, i32) {
    %c0_i32 = arith.constant 0 : i32
    %c0_i32_0 = arith.constant 0 : i32
    %c0_i32_1 = arith.constant 0 : i32
    return %c0_i32, %c0_i32_0 : i32, i32
  }
  func.func @transform_5(%arg0: i32) -> (i32, i32) {
    %c0_i32 = arith.constant 0 : i32
    %c0_i32_0 = arith.constant 0 : i32
    %c0_i32_1 = arith.constant 0 : i32
    return %c0_i32, %c0_i32_0 : i32, i32
  }
  func.func @transform_6(%arg0: i32) -> (i32, i32) {
    %c0_i32 = arith.constant 0 : i32
    %c0_i32_0 = arith.constant 0 : i32
    %c0_i32_1 = arith.constant 0 : i32
    return %c0_i32, %c0_i32_0 : i32, i32
  }
  func.func @transform_7(%arg0: i32) -> (i32, i32) {
    %c0_i32 = arith.constant 0 : i32
    %c0_i32_0 = arith.constant 0 : i32
    return %arg0, %c0_i32 : i32, i32
  }
}

</mosaic_0001>

<bundles_post_ra>
// kernel: tpu_custom_call.1
= control target key start
LH: loop header
LB: loop body
LE: loop exit
PB: predicated region body
PF: predicated region fallthrough
CT: control target
= control target key end

     0   :  { %s820_s0 = inlined_call_operand.vmem [shape: f32[24,10], index: 0, kind: input, shape index: {}]   ;;  %s821_s1 = inlined_call_operand.vmem [shape: f32[10,128], index: 1, kind: input, shape index: {}]   ;;  %s822_s2 = inlined_call_operand.vmem [shape: f32[1,128], index: 2, kind: input, shape index: {}]   ;;  %s823_s3 = inlined_call_operand.hbm [shape: f32[128,128], index: 3, kind: input, shape index: {}]   ;;  %s824_s4 = inlined_call_operand.vmem [shape: f32[1,128], index: 4, kind: input, shape index: {}]   ;;  %s825_s5 = inlined_call_operand.vmem [shape: f32[1,128], index: 5, kind: input, shape index: {}]   ;;  %s826_s6 = inlined_call_operand.<no memory space> [shape: f32[1,1], index: 6, kind: input, shape index: {}]   ;;  %s827_s7 = inlined_call_operand.vmem [shape: f32[24,1], index: 7, kind: output, shape index: {}]  }
   0x1   :  { %v12_v0 = vstv %s826_s6 }
   0x2   :  { %13 = vst [vmem:[#allocation2] sm:$0x1] %v12_v0 }
   0x3   :  { %14 = vsyncpa [#allocation4], 0  ;;  %s759_s26 = smov 0  }
   0x4 LB: > { %s765_s27 = sadd.s32 4294967295, %s709_s26   ;;  %p569_p0 = scmp.ge.s32.totalorder %s709_s26, 1  ;;  %s709_s26 = sphi %s759_s26, %s20_s26  }
   0x5   : > { %p203_p1 = scmp.lt.s32.totalorder %s709_s26, 4  ;;  %s711_s28 = smov [#allocation3]  }
   0x6   : > { %s221_s6 = sshll.u32 %s711_s28, 4  ;;  %p654_p3 = scmp.eq.s32.totalorder %s765_s27, 0  ;;  %s222_s6 = int_to_ptr.vmem [resolvable:$true] %s221_s6 }
   0x7   : > { %p769_p2 = pnand %p569_p0, %p203_p1  ;;  %s684_s30 = scalar_lea.vmem %s222_s6, 2048 }
   0x8   : > { %p685_p7 = scmp.ne.s32.totalorder %s222_s6, %s684_s30  ;;  %p692_p10 = scmp.lt.s32.totalorder %s222_s6, %s222_s6 }
   0x9   : > { %p650_p4 = pneg %p769_p2  ;;  %p693_p11 = scmp.lt.s32.totalorder %s684_s30, %s684_s30 }
   0xb   : > { %p651_p5 = pnand %p654_p3, %p650_p4  ;;  %p694_p12 = por %p693_p11, %p692_p10 }
   0xd   : > { %p675_p6 = pneg %p651_p5 }
   0xf   : > { %p687_p8 = pnand %p685_p7, %p675_p6 }
  0x11   : > { %p688_p9 = pneg %p687_p8 }
  0x13   : > { %p695_p13 = pnand %p694_p12, %p688_p9 }
  0x15   : > { %698 = shalt.err (!%p695_p13)
}
  0x16   : > { %s712_s8 = smov 128   ;;  %s713_s9 = smov 8  }
  0x17   : > { %653 = dma.hbm_to_vmem [thread:$0]  (!%p651_p5), %s823_s3, 2048, %s222_s6, [#allocation4], %s712_s8, %s712_s8, %s713_s9  }
  0x18   : > { %253 = sbr.rel (%p769_p2) target bundleno = 611 (0x263), region = 48 }
  0x1d   : > { %704 = dma.done.wait (%p654_p3), [#allocation4], 2048  }
  0x1e   : > { %706 = vsyncadd (%p654_p3), [#allocation4], 4294965248  ;;  %p283_p0 = scmp.lt.s32.totalorder %s765_s27, 2  ;;  %v714_v1 = vmov 0.0   ;;  %vm715_vm0 = vmmov 0   ;;  %vm305_vm1 = vcmask 1041408  }
  0x1f   : > { %604 = vmatprep.subr.mxu0 %v714_v1  ;;  %608 = vmatprep.mubr.msk.f32.mxu0 %vm715_vm0, %v714_v1  ;;  %v293_v2 = vld [vmem:[%s821_s1 + $0x8] sm:$0x3]  ;;  %v292_v3 = vld [vmem:[%s821_s1] sm:$0xff]  ;;  %vm301_vm2 = vcmask 80896   ;;  %v395_v6 = vld [vmem:[#allocation3 + $0x70] sm:$0xff]  ;;  %vm500_vm3 = vcmask 7168  }
  0x20   : > { %s830_s27 = smov (!%p283_p0, %s765_s27), 2  ;;  %611 = vmatprep.subr.mxu1 %v714_v1  ;;  %643 = vmatprep.mubr.msk.f32.mxu1 %vm715_vm0, %v714_v1  ;;  %v396_v5 = vld [vmem:[#allocation3 + $0x78] sm:$0xff]  ;;  %v394_v7 = vld [vmem:[#allocation3 + $0x68] sm:$0xff]  ;;  %v393_v8 = vld [vmem:[#allocation3 + $0x60] sm:$0xff] }
  0x21   : > { %s574_s12 = sshll.u32 %s830_s27, 3  ;;  %605 = vmatpush3.msk.msra.mxu0 %vm305_vm1, %v293_v2  ;;  %612 = vmatpush3.msra.mxu1 %v396_v5  ;;  %v392_v9 = vld [vmem:[#allocation3 + $0x58] sm:$0xff]  ;;  %v391_v10 = vld [vmem:[#allocation3 + $0x50] sm:$0xff]  ;;  %v390_v11 = vld [vmem:[#allocation3 + $0x48] sm:$0xff] }
  0x22   : > { %s286_s15 = scalar_lea.vmem %s820_s0, %s574_s12  ;;  %606 = vmatprep.subr.mxu0 %v714_v1  ;;  %613 = vmatprep.subr.mxu1 %v714_v1  ;;  %v389_v12 = vld [vmem:[#allocation3 + $0x40] sm:$0xff]  ;;  %v388_v13 = vld [vmem:[#allocation3 + $0x38] sm:$0xff]  ;;  %v387_v14 = vld [vmem:[#allocation3 + $0x30] sm:$0xff]  ;;  %s290_s29 = scalar_lea.vmem %s827_s7, %s574_s12 }
  0x23   : > { %v291_v4 = vld [vmem:[%s286_s15] sm:$0xff]  ;;  %607 = vmatpush3.msra.mxu0 %v292_v3  ;;  %614 = vmatpush3.msra.mxu1 %v395_v6  ;;  %v386_v15 = vld [vmem:[#allocation3 + $0x28] sm:$0xff]  ;;  %v383_v18 = vld [vmem:[#allocation3 + $0x10] sm:$0xff] }
  0x24   : > { %609 = vmatmul.mubr.msk.f32.vlgmr.msra.gmra.mxu0 %vm301_vm2, %v291_v4  ;;  %615 = vmatprep.subr.mxu1 %v714_v1  ;;  %v385_v16 = vld [vmem:[#allocation3 + $0x20] sm:$0xff]  ;;  %v384_v17 = vld [vmem:[#allocation3 + $0x18] sm:$0xff]  ;;  %v382_v19 = vld [vmem:[#allocation3 + $0x8] sm:$0xff] }
  0x25   : > { %616 = vmatpush3.msra.mxu1 %v394_v7  ;;  %v381_v20 = vld [vmem:[#allocation3] sm:$0xff]  ;;  %v576_v21 = vld [vmem:[%s822_s2] ss:$0 sm:$0xff] }
  0x26   : > { %617 = vmatprep.subr.mxu1 %v714_v1  ;;  %v579_v27 = vld [vmem:[%s824_s4] ss:$0 sm:$0xff] }
  0x27   : > { %618 = vmatpush3.msra.mxu1 %v393_v8  ;;  %v580_v32 = vld [vmem:[%s825_s5] ss:$0 sm:$0xff] }
  0x28   : > { %619 = vmatprep.subr.mxu1 %v714_v1  ;;  %v581_v35 = vld [vmem:[#allocation2] ss:$0 sm:$0xff] }
  0x29   : > { %620 = vmatpush3.msra.mxu1 %v392_v9 }
  0x2a   : > { %621 = vmatprep.subr.mxu1 %v714_v1 }
  0x2b   : > { %622 = vmatpush3.msra.mxu1 %v391_v10 }
  0x2c   : > { %623 = vmatprep.subr.mxu1 %v714_v1 }
  0x2d   : > { %624 = vmatpush3.msra.mxu1 %v390_v11 }
  0x2e   : > { %625 = vmatprep.subr.mxu1 %v714_v1 }
  0x2f   : > { %626 = vmatpush3.msra.mxu1 %v389_v12 }
  0x30   : > { %627 = vmatprep.subr.mxu1 %v714_v1 }
  0x31   : > { %628 = vmatpush3.msra.mxu1 %v388_v13 }
  0x32   : > { %629 = vmatprep.subr.mxu1 %v714_v1 }
  0x33   : > { %630 = vmatpush3.msra.mxu1 %v387_v14 }
  0x34   : > { %631 = vmatprep.subr.mxu1 %v714_v1 }
  0x35   : > { %632 = vmatpush3.msra.mxu1 %v386_v15 }
  0x36   : > { %633 = vmatprep.subr.mxu1 %v714_v1 }
  0x37   : > { %634 = vmatpush3.msra.mxu1 %v385_v16 }
  0x38   : > { %635 = vmatprep.subr.mxu1 %v714_v1 }
  0x39   : > { %636 = vmatpush3.msra.mxu1 %v384_v17 }
  0x3a   : > { %637 = vmatprep.subr.mxu1 %v714_v1 }
  0x3b   : > { %638 = vmatpush3.msra.mxu1 %v383_v18 }
  0x3c   : > { %639 = vmatprep.subr.mxu1 %v714_v1 }
  0x3d   : > { %640 = vmatpush3.msra.mxu1 %v382_v19 }
  0x3e   : > { %641 = vmatprep.subr.mxu1 %v714_v1 }
  0x3f   : > { %642 = vmatpush3.msra.mxu1 %v381_v20 }
  0xe4   : > { %v375_v22 = vpop.f32.mrf.mxu0 }
  0xe5   : > { %v376_v23 = vadd.f32 %v576_v21, %v375_v22 }
  0xe6   : > { %v610_v24 = vpop.f32.mrf.mxu0 }
  0xe7   : > { %v379_v25 = vmul.f32 0.2, %v376_v23 }
  0xe9   : > { %v380_v26 = vmax.f32 %v376_v23, %v379_v25 }
  0xeb   : > { %644 = vmatmul.mubr.f32.vlgmr.msra.gmra.mxu1 %v380_v26 }
 0x1ab   : > { %v470_v28 = vpop.f32.mrf.mxu1 }
 0x1ac   : > { %v471_v29 = vadd.f32 %v579_v27, %v470_v28 }
 0x1ad   : > { %v645_v30 = vpop.f32.mrf.mxu1 }
 0x1ae   : > { %v474_v31 = vmul.f32 0.2, %v471_v29 }
 0x1b0   : > { %v475_v33 = vmax.f32 %v471_v29, %v474_v31 }
 0x1b2   : > { %v483_v34 = vmul.f32 %v580_v32, %v475_v33 }
 0x1b4   : > { %484 = vadd.xlane.f32.xlu0 %v483_v34 }
 0x23d   : > { %v485_v36 = vpop.xlane.xlu0 %484 }
 0x23e   : > { %v493_v37 = vadd.f32 %v581_v35, %v485_v36 }
 0x240   : > { %v494_v38 = vsub.f32 0.0, %v493_v37 }
 0x242   : > { %v495_v39 = vmul.f32 1.442695, %v494_v38 }
 0x244   : > { %669 = vpow2.f32 %v495_v39 }
 0x251   : > { %v670_v40 = vpop.eup %669 }
 0x252   : > { %v497_v41 = vadd.f32 1.0, %v670_v40 }
 0x254   : > { %671 = vrcp.f32 %v497_v41 }
 0x261   : > { %v672_v42 = vpop.eup %671 }
 0x262   : > { %501 = vst.msk [vmem:[%s290_s29] sm:$0xff] %vm500_vm3, %v672_v42 }
 0x263 PF: > { %s20_s26 = sadd.s32 1, %s709_s26  }
 0x264   : > { %p17_p1 = scmp.ge.s32.totalorder %s20_s26, 5  }
 0x266   :  { %19 = sbr.rel (!%p17_p1) target bundleno = 4 (0x4), region = 83 }
 0x26b   :  { %521 = vsyncpa [#allocation4], 1 }
 0x26c   :  { %523 = vsyncpa [#allocation4 + $0x1], 1 }

</bundles_post_ra>
